<compile_context>
chip_gen: v7x
topology: tpu7x:2x2x1
jax: 0.10.0
libtpu: 0.0.40
codegen_flags: <defaults>
</compile_context>

<pallas_src>
import jax
import jax.numpy as jnp
from jax import lax
from jax.experimental import pallas as pl
from jax.experimental.pallas import tpu as pltpu


def _barlow_twins_kernel(z1t_ref, z2_ref, out_ref, acc_ref):
    """One [td, td] tile of cc = (z1n/batch_size).T @ z2n.

    z1t_ref: [td, N]  rows i*td..(i+1)*td of z1n.T (1/batch_size already folded in)
    z2_ref : [N, td]  cols j*td..(j+1)*td of z2n
    out_ref: [1, 8, 128] per-i partials (lane 0: sum(cc^2), 1: sum(diag), 2: sum(diag^2))
    acc_ref: SMEM (3,) f32 running sums across the inner ("arbitrary") j axis
    """
    i = pl.program_id(0)
    j = pl.program_id(1)
    n_j = pl.num_programs(1)

    @pl.when(j == 0)
    def _init():
        acc_ref[0] = jnp.float32(0.0)
        acc_ref[1] = jnp.float32(0.0)
        acc_ref[2] = jnp.float32(0.0)

    # MXU: [td, N] @ [N, td] -> [td, td] with f32 accumulation.
    cc = jnp.dot(z1t_ref[...], z2_ref[...], preferred_element_type=jnp.float32)

    acc_ref[0] = acc_ref[0] + jnp.sum(cc * cc)

    @pl.when(i == j)
    def _diag():
        # Diagonal entries taken from the same cc tile (consistent with sum(cc^2)).
        td = cc.shape[0]
        rows = lax.broadcasted_iota(jnp.int32, (td, td), 0)
        cols = lax.broadcasted_iota(jnp.int32, (td, td), 1)
        dvals = jnp.where(rows == cols, cc, jnp.float32(0.0))
        acc_ref[1] = acc_ref[1] + jnp.sum(dvals)
        acc_ref[2] = acc_ref[2] + jnp.sum(dvals * dvals)

    @pl.when(j == n_j - 1)
    def _finalize():
        lanes = lax.broadcasted_iota(jnp.int32, (1, 8, 128), 2)
        s2 = acc_ref[0]
        d1 = acc_ref[1]
        d2 = acc_ref[2]
        out_ref[...] = jnp.where(
            lanes == 0, s2,
            jnp.where(lanes == 1, d1,
                      jnp.where(lanes == 2, d2, jnp.float32(0.0))))


def _vmem_capacity_bytes():
    try:
        return int(pltpu.get_tpu_info().vmem_capacity_bytes)
    except Exception:
        return 64 * 1024 * 1024  # conservative: v7x per-core VMEM


def _pick_tile_d(d_pad, n_batch, itemsize, vmem_cap, max_tile=1024):
    """Largest 128-multiple divisor of d_pad (<= max_tile) whose double-buffered
    streamed blocks + cc tile fit in ~55% of per-core VMEM."""
    budget = int(vmem_cap * 0.55)
    best = 128
    t = 128
    while t <= min(d_pad, max_tile):
        if d_pad % t == 0:
            est = 4 * n_batch * t * itemsize + 4 * t * t * 4
            if est <= budget:
                best = t
        t += 128
    return best


def barlow_twins_loss(z1, z2, *, batch_size, lambda_coeff=0.005,
                      tile_d=None, use_bf16_matmul=True):
    """Pallas TPU implementation of BarlowTwinsLoss.forward(z1, z2)."""
    assert z1.shape == z2.shape and z1.ndim == 2
    n, d = z1.shape
    assert n >= 2, "unbiased std (ddof=1) needs batch >= 2"
    # Like the PyTorch module, `batch_size` only scales cc; std uses the actual
    # batch dim with ddof=1 (torch.std default).

    # ---- Hoisted one-shot normalization in plain XLA (done once, not per tile) ----
    z1f = z1.astype(jnp.float32)
    z2f = z2.astype(jnp.float32)
    m1 = jnp.mean(z1f, axis=0, keepdims=True)
    m2 = jnp.mean(z2f, axis=0, keepdims=True)
    c1 = z1f - m1
    c2 = z2f - m2
    inv_nm1 = jnp.float32(1.0 / (n - 1))
    inv_std1 = lax.rsqrt(jnp.sum(c1 * c1, axis=0, keepdims=True) * inv_nm1)
    inv_std2 = lax.rsqrt(jnp.sum(c2 * c2, axis=0, keepdims=True) * inv_nm1)
    z1n = c1 * (inv_std1 * jnp.float32(1.0 / batch_size))  # fold 1/batch_size here
    z2n = c2 * inv_std2

    # ---- Pad D to a multiple of 128; zero columns contribute nothing. ----
    d_pad = ((d + 127) // 128) * 128
    if d_pad != d:
        pad = d_pad - d
        z1n = jnp.pad(z1n, ((0, 0), (0, pad)))
        z2n = jnp.pad(z2n, ((0, 0), (0, pad)))

    # ---- bf16 streaming (halves re-read HBM traffic) + pre-transposed z1n. ----
    stream_dtype = jnp.bfloat16 if use_bf16_matmul else jnp.float32
    itemsize = 2 if use_bf16_matmul else 4
    z1t = z1n.T.astype(stream_dtype)          # [D_pad, N]
    z2s = z2n.astype(stream_dtype)            # [N, D_pad]

    vmem_cap = _vmem_capacity_bytes()
    if tile_d is None:
        tile_d = _pick_tile_d(d_pad, n, itemsize, vmem_cap)
    assert tile_d % 128 == 0 and d_pad % tile_d == 0
    num_tiles = d_pad // tile_d

    est = 4 * n * tile_d * itemsize + 4 * tile_d * tile_d * 4
    vmem_limit = int(min(max(2 * est, 32 * 1024 * 1024), int(vmem_cap * 0.75)))

    partials = pl.pallas_call(
        _barlow_twins_kernel,
        out_shape=jax.ShapeDtypeStruct((num_tiles, 8, 128), jnp.float32),
        grid_spec=pltpu.PrefetchScalarGridSpec(
            num_scalar_prefetch=0,
            grid=(num_tiles, num_tiles),
            in_specs=[
                pl.BlockSpec((tile_d, n), lambda i, j: (i, 0)),   # z1t rows (outer)
                pl.BlockSpec((n, tile_d), lambda i, j: (0, j)),   # z2 cols (inner)
            ],
            out_specs=pl.BlockSpec((1, 8, 128), lambda i, j: (i, 0, 0)),
            scratch_shapes=[pltpu.SMEM((3,), jnp.float32)],
        ),
        compiler_params=pltpu.CompilerParams(
            # Outer axis parallel -> v7x megacore shards the per-i partials.
            dimension_semantics=("parallel", "arbitrary"),
            vmem_limit_bytes=vmem_limit,
        ),
    )(z1t, z2s)

    s2 = jnp.sum(partials[:, 0, 0])    # sum(cc^2) over all tiles
    d1 = jnp.sum(partials[:, 0, 1])    # sum(diag)
    d2 = jnp.sum(partials[:, 0, 2])    # sum(diag^2)
    on_diag = d2 - 2.0 * d1 + jnp.float32(d)      # sum((diag - 1)^2), real D only
    off_diag = s2 - d2
    return on_diag + jnp.float32(lambda_coeff) * off_diag


def _reference_loss(z1, z2, *, batch_size, lambda_coeff=0.005):
    """Pure-JAX reference mirroring the PyTorch module exactly."""
    z1 = z1.astype(jnp.float32)
    z2 = z2.astype(jnp.float32)
    z1n = (z1 - jnp.mean(z1, axis=0)) / jnp.std(z1, axis=0, ddof=1)
    z2n = (z2 - jnp.mean(z2, axis=0)) / jnp.std(z2, axis=0, ddof=1)
    cc = (z1n.T @ z2n) / batch_size
    diag = jnp.diagonal(cc)
    on_diag = jnp.sum((diag - 1.0) ** 2)
    off_diag = jnp.sum(cc ** 2) - jnp.sum(diag ** 2)
    return on_diag + lambda_coeff * off_diag


if __name__ == "__main__":
    lambda_coeff = 0.005
    key = jax.random.PRNGKey(0)
    k1, k2, k3, k4, k5, k6 = jax.random.split(key, 6)

    # Case 1: module defaults (batch=8, z_dim=128) -> 1x1 grid, bf16 streaming.
    b1, d1 = 8, 128
    z1 = jax.random.normal(k1, (b1, d1), dtype=jnp.float32)
    z2 = jax.random.normal(k2, (b1, d1), dtype=jnp.float32)
    loss = jax.block_until_ready(
        barlow_twins_loss(z1, z2, batch_size=b1, lambda_coeff=lambda_coeff))
    ref = _reference_loss(z1, z2, batch_size=b1, lambda_coeff=lambda_coeff)
    assert jnp.allclose(loss, ref, rtol=1e-2, atol=1e-2), (loss, ref)

    # Case 2: wider embedding, explicit 128-wide tiles -> 2x2 grid (exercises
    # per-i partial outputs, the diagonal-tile branch and tiled accumulation).
    b2, d2 = 16, 256
    z1b = jax.random.normal(k3, (b2, d2), dtype=jnp.float32)
    z2b = jax.random.normal(k4, (b2, d2), dtype=jnp.float32)
    loss_b = jax.block_until_ready(
        barlow_twins_loss(z1b, z2b, batch_size=b2, lambda_coeff=lambda_coeff,
                          tile_d=128))
    ref_b = _reference_loss(z1b, z2b, batch_size=b2, lambda_coeff=lambda_coeff)
    assert jnp.allclose(loss_b, ref_b, rtol=1e-2, atol=1e-2), (loss_b, ref_b)

    # Case 3: D not a multiple of 128 -> zero-padding path; f32 streaming for a
    # tight match against the reference.
    b3, d3 = 16, 200
    z1c = jax.random.normal(k5, (b3, d3), dtype=jnp.float32)
    z2c = jax.random.normal(k6, (b3, d3), dtype=jnp.float32)
    loss_c = jax.block_until_ready(
        barlow_twins_loss(z1c, z2c, batch_size=b3, lambda_coeff=lambda_coeff,
                          tile_d=128, use_bf16_matmul=False))
    ref_c = _reference_loss(z1c, z2c, batch_size=b3, lambda_coeff=lambda_coeff)
    assert jnp.allclose(loss_c, ref_c, rtol=1e-3, atol=1e-3), (loss_c, ref_c)

    print("KERNEL_OK")
</pallas_src>

<mosaic_0001>
module attributes {stable_mosaic.version = 11 : i64} {
  func.func @_barlow_twins_kernel(%arg0: i32, %arg1: i32, %arg2: memref<128x8xbf16, #tpu.memory_space<vmem>>, %arg3: memref<8x128xbf16, #tpu.memory_space<vmem>>, %arg4: memref<1x8x128xf32, #tpu.memory_space<vmem>>, %arg5: memref<3xf32, #tpu.memory_space<smem>>) attributes {dimension_semantics = [#tpu.dimension_semantics<parallel>, #tpu.dimension_semantics<arbitrary>], iteration_bounds = array<i64: 1, 1>, scalar_prefetch = 0 : i64, scratch_operands = 1 : i64, tpu.core_type = #tpu.core_type<tc>, window_params = [{transform_indices = @transform_0, window_bounds = array<i64: 128, 8>}, {transform_indices = @transform_1, window_bounds = array<i64: 8, 128>}, {transform_indices = @transform_2, window_bounds = array<i64: 1, 8, 128>}]} {
    %c0_i32 = arith.constant 0 : i32
    %0 = arith.cmpi eq, %arg1, %c0_i32 : i32
    %1 = arith.extui %0 : i1 to i32
    %c0_i32_0 = arith.constant 0 : i32
    %2 = arith.cmpi ne, %1, %c0_i32_0 : i32
    scf.if %2 {
      %cst_10 = arith.constant 0.000000e+00 : f32
      %c0_11 = arith.constant 0 : index
      %20 = memref.load %arg5[%c0_11] : memref<3xf32, #tpu.memory_space<smem>>
      memref.store %cst_10, %arg5[%c0_11] : memref<3xf32, #tpu.memory_space<smem>>
      %cst_12 = arith.constant 0.000000e+00 : f32
      %c1 = arith.constant 1 : index
      %21 = memref.load %arg5[%c1] : memref<3xf32, #tpu.memory_space<smem>>
      memref.store %cst_12, %arg5[%c1] : memref<3xf32, #tpu.memory_space<smem>>
      %cst_13 = arith.constant 0.000000e+00 : f32
      %c2 = arith.constant 2 : index
      %22 = memref.load %arg5[%c2] : memref<3xf32, #tpu.memory_space<smem>>
      memref.store %cst_13, %arg5[%c2] : memref<3xf32, #tpu.memory_space<smem>>
    } else {
    }
    %c0 = arith.constant 0 : index
    %c0_1 = arith.constant 0 : index
    %3 = vector.load %arg2[%c0, %c0_1] : memref<128x8xbf16, #tpu.memory_space<vmem>>, vector<128x8xbf16>
    %c0_2 = arith.constant 0 : index
    %c0_3 = arith.constant 0 : index
    %4 = vector.load %arg3[%c0_2, %c0_3] : memref<8x128xbf16, #tpu.memory_space<vmem>>, vector<8x128xbf16>
    %cst = arith.constant dense<0.000000e+00> : vector<128x128xf32>
    %5 = tpu.matmul %3, %4, %cst {dimension_numbers = #tpu.dot_dimension_numbers<[1], [0], [0], [1], [0, 0, 1, 1], [], []>} : vector<128x8xbf16>, vector<8x128xbf16>, vector<128x128xf32> -> vector<128x128xf32>
    %c0_4 = arith.constant 0 : index
    %6 = memref.load %arg5[%c0_4] : memref<3xf32, #tpu.memory_space<smem>>
    %7 = arith.mulf %5, %5 : vector<128x128xf32>
    %8 = vector.shape_cast %7 : vector<128x128xf32> to vector<1x128x128xf32>
    %cst_5 = arith.constant dense<0.000000e+00> : vector<1xf32>
    %9 = vector.multi_reduction <add>, %8, %cst_5 [1, 2] : vector<1x128x128xf32> to vector<1xf32>
    %10 = vector.shape_cast %9 : vector<1xf32> to vector<1x1x1xf32>
    %11 = vector.extract %10[0, 0, 0] : f32 from vector<1x1x1xf32>
    %12 = arith.addf %6, %11 : f32
    %c0_6 = arith.constant 0 : index
    %13 = memref.load %arg5[%c0_6] : memref<3xf32, #tpu.memory_space<smem>>
    memref.store %12, %arg5[%c0_6] : memref<3xf32, #tpu.memory_space<smem>>
    %14 = arith.cmpi eq, %arg0, %arg1 : i32
    %15 = arith.extui %14 : i1 to i32
    %c0_i32_7 = arith.constant 0 : i32
    %16 = arith.cmpi ne, %15, %c0_i32_7 : i32
    scf.if %16 {
      %20 = tpu.iota {dimensions = array<i32: 0>} : vector<128x128xi32>
      %21 = tpu.iota {dimensions = array<i32: 1>} : vector<128x128xi32>
      %22 = arith.cmpi eq, %20, %21 : vector<128x128xi32>
      %cst_10 = arith.constant 0.000000e+00 : f32
      %23 = vector.broadcast %cst_10 : f32 to vector<128x128xf32>
      %24 = arith.select %22, %5, %23 : vector<128x128xi1>, vector<128x128xf32>
      %c1 = arith.constant 1 : index
      %25 = memref.load %arg5[%c1] : memref<3xf32, #tpu.memory_space<smem>>
      %26 = vector.shape_cast %24 : vector<128x128xf32> to vector<1x128x128xf32>
      %cst_11 = arith.constant dense<0.000000e+00> : vector<1xf32>
      %27 = vector.multi_reduction <add>, %26, %cst_11 [1, 2] : vector<1x128x128xf32> to vector<1xf32>
      %28 = vector.shape_cast %27 : vector<1xf32> to vector<1x1x1xf32>
      %29 = vector.extract %28[0, 0, 0] : f32 from vector<1x1x1xf32>
      %30 = arith.addf %25, %29 : f32
      %c1_12 = arith.constant 1 : index
      %31 = memref.load %arg5[%c1_12] : memref<3xf32, #tpu.memory_space<smem>>
      memref.store %30, %arg5[%c1_12] : memref<3xf32, #tpu.memory_space<smem>>
      %c2 = arith.constant 2 : index
      %32 = memref.load %arg5[%c2] : memref<3xf32, #tpu.memory_space<smem>>
      %33 = arith.mulf %24, %24 : vector<128x128xf32>
      %34 = vector.shape_cast %33 : vector<128x128xf32> to vector<1x128x128xf32>
      %cst_13 = arith.constant dense<0.000000e+00> : vector<1xf32>
      %35 = vector.multi_reduction <add>, %34, %cst_13 [1, 2] : vector<1x128x128xf32> to vector<1xf32>
      %36 = vector.shape_cast %35 : vector<1xf32> to vector<1x1x1xf32>
      %37 = vector.extract %36[0, 0, 0] : f32 from vector<1x1x1xf32>
      %38 = arith.addf %32, %37 : f32
      %c2_14 = arith.constant 2 : index
      %39 = memref.load %arg5[%c2_14] : memref<3xf32, #tpu.memory_space<smem>>
      memref.store %38, %arg5[%c2_14] : memref<3xf32, #tpu.memory_space<smem>>
    } else {
    }
    %c0_i32_8 = arith.constant 0 : i32
    %17 = arith.cmpi eq, %arg1, %c0_i32_8 : i32
    %18 = arith.extui %17 : i1 to i32
    %c0_i32_9 = arith.constant 0 : i32
    %19 = arith.cmpi ne, %18, %c0_i32_9 : i32
    scf.if %19 {
      %20 = tpu.iota {dimensions = array<i32: 2>} : vector<1x8x128xi32>
      %c0_10 = arith.constant 0 : index
      %21 = memref.load %arg5[%c0_10] : memref<3xf32, #tpu.memory_space<smem>>
      %c1 = arith.constant 1 : index
      %22 = memref.load %arg5[%c1] : memref<3xf32, #tpu.memory_space<smem>>
      %c2 = arith.constant 2 : index
      %23 = memref.load %arg5[%c2] : memref<3xf32, #tpu.memory_space<smem>>
      %c0_i32_11 = arith.constant 0 : i32
      %24 = vector.broadcast %c0_i32_11 : i32 to vector<1x8x128xi32>
      %25 = arith.cmpi eq, %20, %24 : vector<1x8x128xi32>
      %c1_i32 = arith.constant 1 : i32
      %26 = vector.broadcast %c1_i32 : i32 to vector<1x8x128xi32>
      %27 = arith.cmpi eq, %20, %26 : vector<1x8x128xi32>
      %c2_i32 = arith.constant 2 : i32
      %28 = vector.broadcast %c2_i32 : i32 to vector<1x8x128xi32>
      %29 = arith.cmpi eq, %20, %28 : vector<1x8x128xi32>
      %cst_12 = arith.constant 0.000000e+00 : f32
      %30 = vector.broadcast %23 : f32 to vector<1x8x128xf32>
      %31 = vector.broadcast %cst_12 : f32 to vector<1x8x128xf32>
      %32 = arith.select %29, %30, %31 : vector<1x8x128xi1>, vector<1x8x128xf32>
      %33 = vector.broadcast %22 : f32 to vector<1x8x128xf32>
      %34 = arith.select %27, %33, %32 : vector<1x8x128xi1>, vector<1x8x128xf32>
      %35 = vector.broadcast %21 : f32 to vector<1x8x128xf32>
      %36 = arith.select %25, %35, %34 : vector<1x8x128xi1>, vector<1x8x128xf32>
      %c0_13 = arith.constant 0 : index
      %c0_14 = arith.constant 0 : index
      %c0_15 = arith.constant 0 : index
      %37 = vector.load %arg4[%c0_13, %c0_14, %c0_15] : memref<1x8x128xf32, #tpu.memory_space<vmem>>, vector<1x8x128xf32>
      tpu.vector_store %arg4[%c0_13, %c0_14, %c0_15], %36 {strides = array<i32>} : memref<1x8x128xf32, #tpu.memory_space<vmem>>, vector<1x8x128xf32>,
    } else {
    }
    return
  }
  func.func @transform_0(%arg0: i32, %arg1: i32) -> (i32, i32) {
    %c0_i32 = arith.constant 0 : i32
    %c0_i32_0 = arith.constant 0 : i32
    return %arg0, %c0_i32 : i32, i32
  }
  func.func @transform_1(%arg0: i32, %arg1: i32) -> (i32, i32) {
    %c0_i32 = arith.constant 0 : i32
    %c0_i32_0 = arith.constant 0 : i32
    return %c0_i32, %arg1 : i32, i32
  }
  func.func @transform_2(%arg0: i32, %arg1: i32) -> (i32, i32, i32) {
    %c0_i32 = arith.constant 0 : i32
    %c0_i32_0 = arith.constant 0 : i32
    %c0_i32_1 = arith.constant 0 : i32
    return %arg0, %c0_i32, %c0_i32_0 : i32, i32, i32
  }
}

</mosaic_0001>

<bundles_post_ra>
// kernel: tpu_custom_call.1
= control target key start
LH: loop header
LB: loop body
LE: loop exit
PB: predicated region body
PF: predicated region fallthrough
CT: control target
= control target key end

     0   :  { %vm105_vm0 = vcmask 1043456   ;;  %vm80_vm1 = vcmask 64512   ;;  %s633_s0 = inlined_call_operand.vmem [shape: bf16[128,8], index: 0, kind: input, shape index: {}]   ;;  %s634_s1 = inlined_call_operand.vmem [shape: bf16[8,128], index: 1, kind: input, shape index: {}]   ;;  %s635_s2 = inlined_call_operand.hbm [shape: f32[1,8,128], index: 2, kind: output, shape index: {}]  }
   0x1   :  { %v39_v0 = vld [vmem:[%s634_s1] sm:$0xf]  ;;  %v468_v3 = vld [vmem:[%s633_s0 + $0x8] sm:$0xff]   ;;  %v469_v4 = vld [vmem:[%s633_s0 + $0x10] sm:$0xff]  }
   0x2   :  { %v467_v1 = vld [vmem:[%s633_s0] sm:$0xff]   ;;  %458 = vmatprep.subr.msk.bf16.mxu0 %vm105_vm0, %v39_v0  ;;  %v107_v2 = vsel %vm105_vm0, %v39_v0, 0  ;;  %459 = vmatprep.subr.msk.bf16.mxu1 %vm105_vm0, %v39_v0  ;;  %v472_v6 = vld [vmem:[%s633_s0 + $0x28] sm:$0xff]   ;;  %v473_v7 = vld [vmem:[%s633_s0 + $0x30] sm:$0xff]  }
   0x3   :  { %439 = vmatpush3.bf16.msra.mxu0 %v107_v2  ;;  %440 = vmatprep.mubr.msk.bf16.mxu0 %vm80_vm1, %v467_v1  ;;  %v471_v5 = vld [vmem:[%s633_s0 + $0x20] sm:$0xff]  }
   0x4   :  { %457 = vmatpush3.bf16.msra.mxu1 %v107_v2  ;;  %448 = vmatprep.mubr.msk.bf16.mxu1 %vm80_vm1, %v471_v5 }
   0x6   :  { %441 = vmatmul.mubr.msk.bf16.vlgmr.msra.gmra.mrb[0].mxu0 %vm80_vm1, %v468_v3 }
   0x7   :  { %444 = vmatprep.mubr.msk.bf16.mxu0 %vm80_vm1, %v469_v4  ;;  %449 = vmatmul.mubr.msk.bf16.vlgmr.msra.gmra.mrb[0].mxu1 %vm80_vm1, %v472_v6 }
   0x8   :  { %7 = vsyncpa [#allocation4], 0  ;;  %v470_v8 = vld [vmem:[%s633_s0 + $0x18] sm:$0xff]   ;;  %452 = vmatprep.mubr.msk.bf16.mxu1 %vm80_vm1, %v473_v7  ;;  %v254_v10 = vlaneseq  ;;  %s499_s28 = smov [#allocation3]  }
   0x9   :  { %v474_v9 = vld [vmem:[%s633_s0 + $0x38] sm:$0xff]   ;;  %s401_s29 = sshll.u32 %s499_s28, 4  ;;  %s402_s29 = int_to_ptr.vmem [resolvable:$true] %s401_s29 }
   0xa   :  { %v550_v11 = vshrl.u32 %v254_v10, 7  ;;  %v552_v12 = vand.u32 127, %v254_v10  ;;  %s475_s30 = scalar_lea.vmem %s402_s29, 128  ;;  %p480_p1 = scmp.lt.s32.totalorder %s402_s29, %s402_s29 }
   0xb   :  { %p476_p0 = scmp.ne.s32.totalorder %s402_s29, %s475_s30  ;;  %p481_p2 = scmp.lt.s32.totalorder %s475_s30, %s475_s30 }
   0xc   :  { %v257_v13 = vadd.s32 16, %v550_v11  ;;  %v256_v14 = vadd.s32 8, %v550_v11  ;;  %vm273_vm2 = vcmp.eq.s32.totalorder %v550_v11, %v552_v12  ;;  %v258_v15 = vadd.s32 24, %v550_v11 }
   0xd   :  { %v261_v16 = vadd.s32 48, %v550_v11  ;;  %v259_v19 = vadd.s32 32, %v550_v11  ;;  %v262_v22 = vadd.s32 56, %v550_v11  ;;  %v260_v24 = vadd.s32 40, %v550_v11  ;;  %p482_p3 = por %p481_p2, %p480_p1 }
   0xe   :  { %445 = vmatmul.mubr.msk.bf16.gmra.mrb[4].mxu0 %vm80_vm1, %v470_v8  ;;  %vm275_vm3 = vcmp.eq.s32.totalorder %v257_v13, %v552_v12  ;;  %vm274_vm4 = vcmp.eq.s32.totalorder %v256_v14, %v552_v12  ;;  %vm276_vm5 = vcmp.eq.s32.totalorder %v258_v15, %v552_v12  ;;  %v263_v42 = vadd.s32 64, %v550_v11 }
   0xf   :  { %453 = vmatmul.mubr.msk.bf16.gmra.mrb[4].mxu1 %vm80_vm1, %v474_v9  ;;  %vm279_vm6 = vcmp.eq.s32.totalorder %v261_v16, %v552_v12  ;;  %vm277_vm7 = vcmp.eq.s32.totalorder %v259_v19, %v552_v12  ;;  %vm280_vm8 = vcmp.eq.s32.totalorder %v262_v22, %v552_v12  ;;  %vm278_vm9 = vcmp.eq.s32.totalorder %v260_v24, %v552_v12  ;;  %p483_p4 = pnand %p482_p3, %p476_p0 }
  0x10   :  { %v265_v46 = vadd.s32 80, %v550_v11  ;;  %v264_v51 = vadd.s32 72, %v550_v11  ;;  %v266_v56 = vadd.s32 88, %v550_v11  ;;  %vm281_vm10 = vcmp.eq.s32.totalorder %v263_v42, %v552_v12 }
  0x12   :  { %vm282_vm11 = vcmp.eq.s32.totalorder %v264_v51, %v552_v12  ;;  %vm283_vm12 = vcmp.eq.s32.totalorder %v265_v46, %v552_v12  ;;  %vm284_vm13 = vcmp.eq.s32.totalorder %v266_v56, %v552_v12 }
  0xd9   :  { %v442_v17 = vpop.f32.mrb[0].mxu0 }
  0xda   :  { %v143_v18 = vpop.f32.mrb[1].mxu0  ;;  %v567_v25 = vpop.f32.mrb[0].mxu1  ;;  %v291_v26 = vsel %vm275_vm3, %v442_v17, 0.0  ;;  %v209_v35 = vmul.f32 %v442_v17, %v442_v17  ;;  %v267_v17 = vadd.s32 96, %v550_v11  ;;  %vm386_vm3 = vcmp.eq.s32.totalorder %v552_v12, 1 }
  0xdb   :  { %v289_v20 = vsel %vm273_vm2, %v143_v18, 0.0  ;;  %v443_v21 = vpop.f32.mrb[2].mxu0  ;;  %v207_v27 = vmul.f32 %v143_v18, %v143_v18  ;;  %v175_v30 = vpop.f32.mrb[1].mxu1  ;;  %v336_v39 = vmul.f32 %v291_v26, %v291_v26  ;;  %vm387_vm2 = vcmp.eq.s32.totalorder %v552_v12, 2 }
  0xdc   :  { %v146_v23 = vpop.f32.mrb[3].mxu0  ;;  %v334_v31 = vmul.f32 %v289_v20, %v289_v20  ;;  %v570_v34 = vpop.f32.mrb[2].mxu1  ;;  %v292_v36 = vsel %vm276_vm5, %v443_v21, 0.0  ;;  %v210_v43 = vmul.f32 %v443_v21, %v443_v21  ;;  %v297_v10 = vsel %vm281_vm10, %v175_v30, 0.0 }
  0xdd   :  { %v208_v28 = vmul.f32 %v146_v23, %v146_v23  ;;  %v290_v29 = vsel %vm274_vm4, %v146_v23, 0.0  ;;  %v178_v38 = vpop.f32.mrb[3].mxu1  ;;  %v337_v47 = vmul.f32 %v292_v36, %v292_v36  ;;  %vm285_vm14 = vcmp.eq.s32.totalorder %v267_v17, %v552_v12 }
  0xde   :  { %v306_v32 = vadd.f32 %v290_v29, %v289_v20  ;;  %v335_v33 = vmul.f32 %v290_v29, %v290_v29  ;;  %v215_v20 = vmul.f32 %v175_v30, %v175_v30  ;;  %v298_v22 = vsel %vm282_vm11, %v178_v38, 0.0 }
  0xdf   :  { %v223_v37 = vadd.f32 %v208_v28, %v207_v27  ;;  %v216_v30 = vmul.f32 %v178_v38, %v178_v38  ;;  %v300_v42 = vsel %vm284_vm13, %v570_v34, 0.0  ;;  %v218_v38 = vmul.f32 %v570_v34, %v570_v34 }
  0xe0   :  { %v307_v40 = vadd.f32 %v306_v32, %v291_v26  ;;  %v350_v41 = vadd.f32 %v335_v33, %v334_v31  ;;  %v342_v26 = vmul.f32 %v297_v10, %v297_v10  ;;  %v268_v31 = vadd.s32 104, %v550_v11 }
  0xe1   :  { %v224_v44 = vadd.f32 %v223_v37, %v209_v35  ;;  %v446_v45 = vpop.f32.mrb[4].mxu0  ;;  %v299_v32 = vsel %vm283_vm12, %v567_v25, 0.0  ;;  %v269_v35 = vadd.s32 112, %v550_v11  ;;  %vm385_vm4 = vcmp.eq.s32.totalorder %v552_v12, 0 }
  0xe2   :  { %v351_v48 = vadd.f32 %v350_v41, %v336_v39  ;;  %v159_v49 = vpop.f32.mrb[5].mxu0  ;;  %v308_v50 = vadd.f32 %v307_v40, %v292_v36  ;;  %v583_v61 = vpop.f32.mrb[4].mxu1  ;;  %v295_v62 = vsel %vm279_vm6, %v446_v45, 0.0  ;;  %v213_v7 = vmul.f32 %v446_v45, %v446_v45 }
  0xe3   :  { %v211_v52 = vmul.f32 %v159_v49, %v159_v49  ;;  %v225_v53 = vadd.f32 %v224_v44, %v210_v43  ;;  %v293_v54 = vsel %vm277_vm7, %v159_v49, 0.0  ;;  %v447_v55 = vpop.f32.mrb[6].mxu0  ;;  %v191_v2 = vpop.f32.mrb[5].mxu1  ;;  %v340_v14 = vmul.f32 %v295_v62, %v295_v62 }
  0xe4   :  { %v309_v57 = vadd.f32 %v308_v50, %v293_v54  ;;  %v338_v58 = vmul.f32 %v293_v54, %v293_v54  ;;  %v352_v59 = vadd.f32 %v351_v48, %v337_v47  ;;  %v162_v60 = vpop.f32.mrb[7].mxu0  ;;  %v590_v6 = vpop.f32.mrb[6].mxu1  ;;  %v296_v8 = vsel %vm280_vm8, %v447_v55, 0.0 }
  0xe5   :  { %v226_v63 = vadd.f32 %v225_v53, %v211_v52  ;;  %v212_v0 = vmul.f32 %v162_v60, %v162_v60  ;;  %v294_v1 = vsel %vm278_vm9, %v162_v60, 0.0  ;;  %v194_v13 = vpop.f32.mrb[7].mxu1  ;;  %v214_v18 = vmul.f32 %v447_v55, %v447_v55 }
  0xe6   :  { %v353_v3 = vadd.f32 %v352_v59, %v338_v58  ;;  %v310_v4 = vadd.f32 %v309_v57, %v294_v1  ;;  %v339_v5 = vmul.f32 %v294_v1, %v294_v1  ;;  %v341_v21 = vmul.f32 %v296_v8, %v296_v8 }
  0xe7   :  { %v227_v9 = vadd.f32 %v226_v63, %v212_v0  ;;  %v343_v39 = vmul.f32 %v298_v22, %v298_v22  ;;  %v270_v40 = vadd.s32 120, %v550_v11  ;;  %v217_v41 = vmul.f32 %v567_v25, %v567_v25 }
  0xe8   :  { %v311_v15 = vadd.f32 %v310_v4, %v295_v62  ;;  %v354_v16 = vadd.f32 %v353_v3, %v339_v5  ;;  %v301_v44 = vsel %vm285_vm14, %v191_v2, 0.0  ;;  %v344_v45 = vmul.f32 %v299_v32, %v299_v32 }
  0xe9   :  { %v228_v19 = vadd.f32 %v227_v9, %v213_v7  ;;  %vm286_vm15 = vcmp.eq.s32.totalorder %v268_v31, %v552_v12  ;;  %vm287_vm0 = vcmp.eq.s32.totalorder %v269_v35, %v552_v12  ;;  %v219_v49 = vmul.f32 %v191_v2, %v191_v2 }
  0xea   :  { %v355_v23 = vadd.f32 %v354_v16, %v340_v14  ;;  %v312_v24 = vadd.f32 %v311_v15, %v296_v8  ;;  %v345_v11 = vmul.f32 %v300_v42, %v300_v42  ;;  %v346_v25 = vmul.f32 %v301_v44, %v301_v44 }
  0xeb   :  { %v229_v27 = vadd.f32 %v228_v19, %v214_v18  ;;  %v302_v53 = vsel %vm286_vm15, %v194_v13, 0.0  ;;  %vm288_vm1 = vcmp.eq.s32.totalorder %v270_v40, %v552_v12  ;;  %v303_v56 = vsel %vm287_vm0, %v583_v61, 0.0 }
  0xec   :  { %v313_v28 = vadd.f32 %v312_v24, %v297_v10  ;;  %v356_v29 = vadd.f32 %v355_v23, %v341_v21  ;;  %v220_v58 = vmul.f32 %v194_v13, %v194_v13  ;;  %v347_v60 = vmul.f32 %v302_v53, %v302_v53 }
  0xed   :  { %v230_v33 = vadd.f32 %v229_v27, %v215_v20  ;;  %v221_v62 = vmul.f32 %v583_v61, %v583_v61  ;;  %v304_v63 = vsel %vm288_vm1, %v590_v6, 0.0  ;;  %v348_v1 = vmul.f32 %v303_v56, %v303_v56 }
  0xee   :  { %v357_v36 = vadd.f32 %v356_v29, %v342_v26  ;;  %v314_v37 = vadd.f32 %v313_v28, %v298_v22  ;;  %v222_v4 = vmul.f32 %v590_v6, %v590_v6  ;;  %v349_v7 = vmul.f32 %v304_v63, %v304_v63 }
  0xef   :  { %v231_v43 = vadd.f32 %v230_v33, %v216_v30 }
  0xf0   :  { %v315_v46 = vadd.f32 %v314_v37, %v299_v32  ;;  %v358_v47 = vadd.f32 %v357_v36, %v343_v39 }
  0xf1   :  { %v232_v48 = vadd.f32 %v231_v43, %v217_v41 }
  0xf2   :  { %v359_v50 = vadd.f32 %v358_v47, %v344_v45  ;;  %v316_v51 = vadd.f32 %v315_v46, %v300_v42 }
  0xf3   :  { %v233_v52 = vadd.f32 %v232_v48, %v218_v38 }
  0xf4   :  { %v317_v54 = vadd.f32 %v316_v51, %v301_v44  ;;  %v360_v55 = vadd.f32 %v359_v50, %v345_v11 }
  0xf5   :  { %v234_v57 = vadd.f32 %v233_v52, %v219_v49 }
  0xf6   :  { %v361_v59 = vadd.f32 %v360_v55, %v346_v25  ;;  %v318_v34 = vadd.f32 %v317_v54, %v302_v53 }
  0xf7   :  { %v235_v0 = vadd.f32 %v234_v57, %v220_v58 }
  0xf8   :  { %v362_v2 = vadd.f32 %v361_v59, %v347_v60  ;;  %v319_v3 = vadd.f32 %v318_v34, %v303_v56 }
  0xf9   :  { %v236_v5 = vadd.f32 %v235_v0, %v221_v62 }
  0xfa   :  { %v363_v8 = vadd.f32 %v362_v2, %v348_v1  ;;  %v320_v9 = vadd.f32 %v319_v3, %v304_v63 }
  0xfb   :  { %v237_v10 = vadd.f32 %v236_v5, %v222_v4 }
  0xfc   :  { %v364_v13 = vadd.f32 %v363_v8, %v349_v7 }
  0xfd   :  { %238 = vadd.xlane.f32.xlu0 %v237_v10 }
  0xfe   :  { %365 = vadd.xlane.f32.xlu1 %v364_v13 }
 0x101   :  { %321 = vadd.xlane.f32.xlu0 %v320_v9 }
 0x18a   :  { %v239_v14 = vpop.xlane.xlu0 %238 }
 0x18b   :  { %v240_v61 = vrot.slane %v239_v14, 4  ;;  %v366_v15 = vpop.xlane.xlu1 %365 }
 0x18c   :  { %v367_v16 = vrot.slane %v366_v15, 4 }
 0x18d   :  { %v241_v17 = vadd.f32 %v240_v61, %v239_v14 }
 0x18e   :  { %v368_v18 = vadd.f32 %v367_v16, %v366_v15  ;;  %v322_v19 = vpop.xlane.xlu0 %321 }
 0x18f   :  { %v242_v20 = vrot.slane %v241_v17, 2  ;;  %v323_v21 = vrot.slane %v322_v19, 4 }
 0x190   :  { %v369_v23 = vrot.slane %v368_v18, 2 }
 0x191   :  { %v324_v6 = vadd.f32 %v323_v21, %v322_v19  ;;  %v243_v24 = vadd.f32 %v242_v20, %v241_v17 }
 0x192   :  { %v370_v26 = vadd.f32 %v369_v23, %v368_v18 }
 0x193   :  { %v325_v27 = vrot.slane %v324_v6, 2  ;;  %v244_v22 = vrot.slane %v243_v24, 1 }
 0x194   :  { %v371_v31 = vrot.slane %v370_v26, 1 }
 0x195   :  { %v326_v28 = vadd.f32 %v325_v27, %v324_v6  ;;  %v245_v29 = vadd.f32 %v244_v22, %v243_v24 }
 0x196   :  { %v372_v30 = vadd.f32 %v371_v31, %v370_v26 }
 0x197   :  { %460 = vpush %v245_v29  ;;  %v327_v32 = vrot.slane %v326_v28, 1 }
 0x199   :  { %v328_v33 = vadd.f32 %v327_v32, %v326_v28 }
 0x19b   :  { %462 = vpush %v328_v33 }
 0x19c   :  { %464 = vpush %v372_v30 }
 0x1c8   :  { %s461_s0 = spop %460 }
 0x1c9   :  { %v392_v39 = vstv %s461_s0 }
 0x1cc   :  { %s463_s26 = spop %462 }
 0x1cd   :  { %v390_v35 = vstv %s463_s26  ;;  %s465_s27 = spop %464 }
 0x1ce   :  { %v388_v36 = vstv %s465_s27 }
 0x1cf   :  { %v389_v37 = vsel %vm387_vm2, %v388_v36, 0.0 }
 0x1d0   :  { %v391_v40 = vsel %vm386_vm3, %v390_v35, %v389_v37 }
 0x1d1   :  { %v393_v41 = vsel %vm385_vm4, %v392_v39, %v391_v40 }
 0x1d2   :  { %394 = vst [vmem:[#allocation3] sm:$0xff] %v393_v41 }
 0x1d3   :  { %486 = shalt.err (!%p483_p4)
}
 0x1d4   :  { %s487_s5 = scalar_lea.hbm %s635_s2, 128 }
 0x1d5   :  { %p488_p5 = scmp.ne.s32.totalorder %s635_s2, %s487_s5  ;;  %p491_p6 = scmp.lt.u32.totalorder %s487_s5, %s635_s2 }
 0x1d7   :  { %p493_p7 = pnand %p491_p6, %p488_p5 }
 0x1d9   :  { %496 = shalt.err (!%p493_p7)
}
 0x1da   :  { %404 = dma.vmem_to_hbm [thread:$0]  %s402_s29, 128, %s635_s2, [#allocation4]  }
 0x1db   :  { %497 = dma.done.wait [#allocation4], 128  }
 0x1dc   :  { %498 = vsyncadd [#allocation4], 4294967168 }
 0x1dd   :  { %408 = vsyncpa [#allocation4], 1 }

</bundles_post_ra>
